<compile_context>
chip_gen: v7x
topology: tpu7x:2x2x1
jax: 0.10.0
libtpu: 0.0.40
codegen_flags: <defaults>
</compile_context>

<pallas_src>
import functools

import jax
import jax.numpy as jnp
from jax.experimental import pallas as pl
from jax.experimental.pallas import tpu as pltpu

_NEG_LARGE = -1e30   # "minus infinity" for padded logit lanes (finite -> no NaNs)
_LANES = 128


def _round_up(x, m):
    return (x + m - 1) // m * m


# ---------------------------------------------------------------------------
# Kernel: one MXU matmul + bias + exact softmax over the lane axis.
# ---------------------------------------------------------------------------
def _fused_affine_softmax_kernel(x_ref, w_ref, b_ref, o_ref):
    # In-kernel f32 -> bf16 cast of the activation tile (no separate XLA
    # cast/pad pass over x in HBM).
    x = x_ref[...].astype(jnp.bfloat16)                              # (bb, 784)
    logits = jnp.dot(x, w_ref[...],
                     preferred_element_type=jnp.float32) + b_ref[...]
    # softmax over the lane axis; padded lanes carry a -1e30 bias -> exp == 0,
    # so the result equals softmax over the real 10 classes.
    m = jnp.max(logits, axis=-1, keepdims=True)
    e = jnp.exp(logits - m)
    denom = jnp.sum(e, axis=-1, keepdims=True)
    o_ref[...] = (e / denom).astype(o_ref.dtype)          # exact normalization


# ---------------------------------------------------------------------------
# One-time parameter preparation (hoisted out of the per-forward hot path).
# ---------------------------------------------------------------------------
def prepare_params(w1, b1, w2, b2, w3, b3):
    """Fuse the activation-free affine stack in f32 and lay it out for TPU."""
    wf = (w1 @ w2) @ w3                                   # (784, 10), f32
    bf = (b1 @ w2 + b2) @ w3 + b3                         # (10,),     f32
    n_classes = wf.shape[1]
    do = _round_up(n_classes, _LANES)
    wf_p = jnp.pad(wf, ((0, 0), (0, do - n_classes))).astype(jnp.bfloat16)
    bf_p = jnp.pad(bf.astype(jnp.float32).reshape(1, -1),
                   ((0, 0), (0, do - n_classes)),
                   constant_values=_NEG_LARGE)
    return wf_p, bf_p, n_classes


# ---------------------------------------------------------------------------
# Forward wrapper: the pallas_call is the only op in the hot path
# (plus a small (B, 10) column slice of the padded output).
# ---------------------------------------------------------------------------
@functools.partial(jax.jit, static_argnames=("n_classes", "block_b"))
def three_layer_fc_forward(x, wf_p, bf_p, *, n_classes, block_b=1024):
    B, D_in = x.shape
    DO = wf_p.shape[1]

    # Batch tile: a single full-array block when the batch fits (no padding,
    # no extra grid steps); otherwise block_b-row tiles (multiple of 8), the
    # last partial block handled by Pallas' built-in masking.
    if B <= block_b:
        bb = B
    else:
        bb = _round_up(min(block_b, B), 8)
    grid = (pl.cdiv(B, bb),)

    in_specs = [
        pl.BlockSpec((bb, D_in), lambda i: (i, 0)),   # x tile (batch-tiled, f32)
        pl.BlockSpec((D_in, DO), lambda i: (0, 0)),   # fused W (resident, bf16)
        pl.BlockSpec((1, DO), lambda i: (0, 0)),      # fused bias (resident, f32)
    ]
    out_specs = pl.BlockSpec((bb, DO), lambda i: (i, 0))

    cost = pl.CostEstimate(
        flops=2 * B * D_in * DO,
        transcendentals=B * DO,                                        # exp
        bytes_accessed=B * D_in * 4 + B * DO * 4 + D_in * DO * 2 + DO * 4,
    )

    out = pl.pallas_call(
        _fused_affine_softmax_kernel,
        out_shape=jax.ShapeDtypeStruct((B, DO), jnp.float32),
        grid=grid,
        in_specs=in_specs,
        out_specs=out_specs,
        cost_estimate=cost,
        compiler_params=pltpu.CompilerParams(
            dimension_semantics=("parallel",),
            vmem_limit_bytes=64 * 1024 * 1024,
        ),
    )(x, wf_p, bf_p)

    # Consumers that can use the 128-lane padded block directly may skip this
    # slice and avoid one extra small pass over the output.
    return out[:, :n_classes]


# ---------------------------------------------------------------------------
# Deterministic init + references
# ---------------------------------------------------------------------------
def init_params(key):
    """Init matching nn.Linear shapes (weights stored transposed as (in, out))."""
    def linear(k, fan_in, fan_out):
        kw, kb = jax.random.split(k)
        bound = 1.0 / jnp.sqrt(fan_in)
        w = jax.random.uniform(kw, (fan_in, fan_out), jnp.float32, -bound, bound)
        b = jax.random.uniform(kb, (fan_out,), jnp.float32, -bound, bound)
        return w, b

    k1, k2, k3 = jax.random.split(key, 3)
    w1, b1 = linear(k1, 784, 120)
    w2, b2 = linear(k2, 120, 80)
    w3, b3 = linear(k3, 80, 10)
    return w1, b1, w2, b2, w3, b3


def reference_forward_f32(x, w1, b1, w2, b2, w3, b3):
    """Pure f32 reference == PyTorch module semantics."""
    h1 = x @ w1 + b1
    h2 = h1 @ w2 + b2
    logits = h2 @ w3 + b3
    return jax.nn.softmax(logits, axis=1)


def reference_forward_fused_mixed(x, wf_p, bf_p, n_classes):
    """Mirrors the kernel's fused bf16-operand / f32-accumulate arithmetic."""
    logits = jnp.dot(x.astype(jnp.bfloat16), wf_p,
                     preferred_element_type=jnp.float32) + bf_p
    return jax.nn.softmax(logits, axis=1)[:, :n_classes]


if __name__ == "__main__":
    key = jax.random.PRNGKey(0)
    kx, kp = jax.random.split(key)

    B = 32
    x = jax.random.normal(kx, (B, 784), dtype=jnp.float32)
    params = init_params(kp)
    wf_p, bf_p, n_classes = prepare_params(*params)   # hoisted: runs once

    out = three_layer_fc_forward(x, wf_p, bf_p, n_classes=n_classes)
    out = jax.block_until_ready(out)

    ref_mixed = reference_forward_fused_mixed(x, wf_p, bf_p, n_classes)
    ref_f32 = reference_forward_f32(x, *params)

    assert out.shape == (B, 10), f"bad shape {out.shape}"
    # tight check vs the same-precision fused reference (only exp/reduction
    # implementation details differ); looser check vs the pure-f32
    # PyTorch-semantics reference (bf16 operand rounding).
    assert jnp.allclose(out, ref_mixed, atol=2e-3, rtol=2e-3), \
        "mismatch vs fused mixed-precision reference"
    assert jnp.allclose(out, ref_f32, atol=2e-2, rtol=2e-2), \
        "mismatch vs f32 reference"
    assert jnp.allclose(jnp.sum(out, axis=1), 1.0, atol=1e-3), \
        "softmax rows must sum to ~1"

    print("KERNEL_OK")
</pallas_src>

<mosaic_0001>
module attributes {stable_mosaic.version = 11 : i64} {
  func.func @_fused_affine_softmax_kernel(%arg0: i32, %arg1: memref<32x784xf32, #tpu.memory_space<vmem>>, %arg2: memref<784x128xbf16, #tpu.memory_space<vmem>>, %arg3: memref<1x128xf32, #tpu.memory_space<vmem>>, %arg4: memref<32x128xf32, #tpu.memory_space<vmem>>) attributes {dimension_semantics = [#tpu.dimension_semantics<parallel>], iteration_bounds = array<i64: 1>, scalar_prefetch = 0 : i64, scratch_operands = 0 : i64, tpu.core_type = #tpu.core_type<tc>, window_params = [{transform_indices = @transform_0, window_bounds = array<i64: 32, 784>}, {pipeline_mode = #tpu.pipeline_mode<synchronous>, transform_indices = @transform_1, window_bounds = array<i64: 784, 128>}, {pipeline_mode = #tpu.pipeline_mode<synchronous>, transform_indices = @transform_2, window_bounds = array<i64: 1, 128>}, {transform_indices = @transform_3, window_bounds = array<i64: 32, 128>}]} {
    %c0 = arith.constant 0 : index
    %c0_0 = arith.constant 0 : index
    %0 = vector.load %arg1[%c0, %c0_0] : memref<32x784xf32, #tpu.memory_space<vmem>>, vector<32x784xf32>
    %1 = arith.truncf %0 : vector<32x784xf32> to vector<32x784xbf16>
    %c0_1 = arith.constant 0 : index
    %c0_2 = arith.constant 0 : index
    %2 = vector.load %arg2[%c0_1, %c0_2] : memref<784x128xbf16, #tpu.memory_space<vmem>>, vector<784x128xbf16>
    %cst = arith.constant dense<0.000000e+00> : vector<32x128xf32>
    %3 = tpu.matmul %1, %2, %cst {dimension_numbers = #tpu.dot_dimension_numbers<[1], [0], [0], [1], [0, 0, 1, 1], [], []>} : vector<32x784xbf16>, vector<784x128xbf16>, vector<32x128xf32> -> vector<32x128xf32>
    %c0_3 = arith.constant 0 : index
    %c0_4 = arith.constant 0 : index
    %4 = vector.load %arg3[%c0_3, %c0_4] : memref<1x128xf32, #tpu.memory_space<vmem>>, vector<1x128xf32>
    %5 = vector.broadcast %4 : vector<1x128xf32> to vector<32x128xf32>
    %6 = arith.addf %3, %5 : vector<32x128xf32>
    %cst_5 = arith.constant dense<0xFF800000> : vector<32xf32>
    %7 = vector.multi_reduction <maximumf>, %6, %cst_5 [1] : vector<32x128xf32> to vector<32xf32>
    %8 = vector.shape_cast %7 : vector<32xf32> to vector<32x1xf32>
    %9 = vector.broadcast %8 : vector<32x1xf32> to vector<32x128xf32>
    %10 = arith.subf %6, %9 : vector<32x128xf32>
    %11 = math.exp %10 : vector<32x128xf32>
    %cst_6 = arith.constant dense<0.000000e+00> : vector<32xf32>
    %12 = vector.multi_reduction <add>, %11, %cst_6 [1] : vector<32x128xf32> to vector<32xf32>
    %13 = vector.shape_cast %12 : vector<32xf32> to vector<32x1xf32>
    %14 = vector.broadcast %13 : vector<32x1xf32> to vector<32x128xf32>
    %15 = arith.divf %11, %14 : vector<32x128xf32>
    %c0_7 = arith.constant 0 : index
    %c0_8 = arith.constant 0 : index
    %16 = vector.load %arg4[%c0_7, %c0_8] : memref<32x128xf32, #tpu.memory_space<vmem>>, vector<32x128xf32>
    tpu.vector_store %arg4[%c0_7, %c0_8], %15 {strides = array<i32>} : memref<32x128xf32, #tpu.memory_space<vmem>>, vector<32x128xf32>,
    return
  }
  func.func @transform_0(%arg0: i32) -> (i32, i32) {
    %c0_i32 = arith.constant 0 : i32
    %c0_i32_0 = arith.constant 0 : i32
    return %arg0, %c0_i32 : i32, i32
  }
  func.func @transform_1(%arg0: i32) -> (i32, i32) {
    %c0_i32 = arith.constant 0 : i32
    %c0_i32_0 = arith.constant 0 : i32
    %c0_i32_1 = arith.constant 0 : i32
    return %c0_i32, %c0_i32_0 : i32, i32
  }
  func.func @transform_2(%arg0: i32) -> (i32, i32) {
    %c0_i32 = arith.constant 0 : i32
    %c0_i32_0 = arith.constant 0 : i32
    %c0_i32_1 = arith.constant 0 : i32
    return %c0_i32, %c0_i32_0 : i32, i32
  }
  func.func @transform_3(%arg0: i32) -> (i32, i32) {
    %c0_i32 = arith.constant 0 : i32
    %c0_i32_0 = arith.constant 0 : i32
    return %arg0, %c0_i32 : i32, i32
  }
}

</mosaic_0001>

<bundles_post_ra>
// kernel: three_layer_fc_forward.1
= control target key start
LH: loop header
LB: loop body
LE: loop exit
PB: predicated region body
PF: predicated region fallthrough
CT: control target
= control target key end

     0   :  { %8 = vsyncpa [#allocation3], 0  ;;  %s1149_s0 = inlined_call_operand.hbm [shape: f32[32,784], index: 0, kind: input, shape index: {}]   ;;  %s1150_s1 = inlined_call_operand.hbm [shape: bf16[784,128], index: 1, kind: input, shape index: {}]   ;;  %s1151_s2 = inlined_call_operand.hbm [shape: f32[1,128], index: 2, kind: input, shape index: {}]   ;;  %s1152_s3 = inlined_call_operand.hbm [shape: f32[32,128], index: 3, kind: output, shape index: {}]  }
   0x1   :  { %9 = vsyncpa [#allocation6], 0 }
   0x2   :  { %10 = vsyncpa [#allocation4], 0  ;;  %s1071_s12 = smov [#allocation5]   ;;  %s977_s16 = scalar_lea.hbm %s1150_s1, 6272 }
   0x3   :  { %s28_s13 = sshll.u32 %s1071_s12, 4  ;;  %p978_p0 = scmp.ne.s32.totalorder %s1150_s1, %s977_s16  ;;  %s29_s13 = int_to_ptr.vmem [resolvable:$true] %s28_s13 }
   0x4   :  { %p981_p1 = scmp.lt.u32.totalorder %s977_s16, %s1150_s1 }
   0x6   :  { %p983_p2 = pnand %p981_p1, %p978_p0 }
   0x8   :  { %986 = shalt.err (!%p983_p2)
}
   0x9   :  { %s987_s21 = scalar_lea.vmem %s29_s13, 6272  ;;  %p992_p4 = scmp.lt.s32.totalorder %s29_s13, %s29_s13 }
   0xa   :  { %p988_p3 = scmp.ne.s32.totalorder %s29_s13, %s987_s21  ;;  %p993_p5 = scmp.lt.s32.totalorder %s987_s21, %s987_s21 }
   0xc   :  { %p994_p6 = por %p993_p5, %p992_p4 }
   0xe   :  { %p995_p7 = pnand %p994_p6, %p988_p3 }
  0x10   :  { %998 = shalt.err (!%p995_p7)
}
  0x11   :  { %s1072_s22 = smov 64   ;;  %s1073_s23 = smov 4  }
  0x12   :  { %34 = dma.hbm_to_vmem [thread:$0]  %s1150_s1, 6272, %s29_s13, [#allocation6], %s1072_s22, %s1072_s22, %s1073_s23  }
  0x13   :  { %s1074_s26 = smov [#allocation2]   ;;  %s999_s30 = scalar_lea.hbm %s1149_s0, 3584 }
  0x14   :  { %s16_s27 = sshll.u32 %s1074_s26, 4  ;;  %p1000_p8 = scmp.ne.s32.totalorder %s1149_s0, %s999_s30  ;;  %s17_s27 = int_to_ptr.vmem [resolvable:$true] %s16_s27 }
  0x15   :  { %p1003_p9 = scmp.lt.u32.totalorder %s999_s30, %s1149_s0 }
  0x17   :  { %p1005_p10 = pnand %p1003_p9, %p1000_p8 }
  0x19   :  { %1008 = shalt.err (!%p1005_p10)
}
  0x1a   :  { %s1009_s8 = scalar_lea.vmem %s17_s27, 3584  ;;  %p1014_p12 = scmp.lt.s32.totalorder %s17_s27, %s17_s27 }
  0x1b   :  { %p1010_p11 = scmp.ne.s32.totalorder %s17_s27, %s1009_s8  ;;  %p1015_p13 = scmp.lt.s32.totalorder %s1009_s8, %s1009_s8 }
  0x1d   :  { %p1016_p0 = por %p1015_p13, %p1014_p12 }
  0x1f   :  { %p1017_p1 = pnand %p1016_p0, %p1010_p11 }
  0x21   :  { %1020 = shalt.err (!%p1017_p1)
}
  0x22   :  { %s1075_s1 = smov 896   ;;  %s1076_s9 = smov 56  }
  0x23   :  { %22 = dma.hbm_to_vmem [thread:$0]  %s1149_s0, 3584, %s17_s27, [#allocation3], %s1075_s1, %s1075_s1, %s1076_s9  }
  0x24   :  { %s1077_s12 = smov [#allocation7]   ;;  %s1021_s16 = scalar_lea.hbm %s1151_s2, 16 }
  0x25   :  { %s41_s13 = sshll.u32 %s1077_s12, 4  ;;  %p1022_p2 = scmp.ne.s32.totalorder %s1151_s2, %s1021_s16  ;;  %s42_s13 = int_to_ptr.vmem [resolvable:$true] %s41_s13 }
  0x26   :  { %p1025_p3 = scmp.lt.u32.totalorder %s1021_s16, %s1151_s2 }
  0x28   :  { %p1027_p4 = pnand %p1025_p3, %p1022_p2 }
  0x2a   :  { %1030 = shalt.err (!%p1027_p4)
}
  0x2b   :  { %s1031_s21 = scalar_lea.vmem %s42_s13, 16  ;;  %s1035_s0 = scalar_lea.vmem %s42_s13, 32 }
  0x2c   :  { %p1032_p5 = scmp.ne.s32.totalorder %s42_s13, %s1031_s21  ;;  %p1036_p6 = scmp.lt.s32.totalorder %s42_s13, %s42_s13 }
  0x2d   :  { %p1037_p7 = scmp.lt.s32.totalorder %s1035_s0, %s1031_s21 }
  0x2f   :  { %p1038_p8 = por %p1037_p7, %p1036_p6 }
  0x31   :  { %p1039_p9 = pnand %p1038_p8, %p1032_p5 }
  0x33   :  { %1042 = shalt.err (!%p1039_p9)
}
  0x34   :  { %44 = dma.hbm_to_vmem [thread:$0]  %s1151_s2, 16, %s42_s13, [#allocation6]  }
  0x35   :  { %1065 = dma.done.wait [#allocation3], 3584  }
  0x36   :  { %1066 = vsyncadd [#allocation3], 4294963712 }
  0x37   :  { %1067 = dma.done.wait [#allocation6], 6288  }
  0x38   :  { %1068 = vsyncadd [#allocation6], 4294961008  ;;  %v912_v0 = vld [vmem:[#allocation5 + $0x40] sm:$0xff]   ;;  %v916_v4 = vld [vmem:[#allocation5 + $0x48] sm:$0xff]   ;;  %vm496_vm0 = vcmask 130048   ;;  %s1078_s2 = smov [#allocation8]  }
  0x39   :  { %v913_v1 = vld [vmem:[#allocation5] sm:$0xff]   ;;  %809 = vmatprep.subr.bf16.mxu0 %v912_v0  ;;  %v917_v5 = vld [vmem:[#allocation5 + $0x8] sm:$0xff]   ;;  %v920_v8 = vld [vmem:[#allocation5 + $0x50] sm:$0xff]   ;;  %s744_s24 = sshll.u32 %s1078_s2, 4  ;;  %s745_s24 = int_to_ptr.vmem [resolvable:$true] %s744_s24 }
  0x3a   :  { %v914_v2 = vld [vmem:[#allocation5 + $0xc0] sm:$0xff]   ;;  %810 = vmatpush3.bf16.msra.mxu0 %v913_v1  ;;  %v918_v6 = vld [vmem:[#allocation5 + $0xc8] sm:$0xff]   ;;  %v921_v9 = vld [vmem:[#allocation5 + $0x10] sm:$0xff]   ;;  %s1043_s25 = scalar_lea.vmem %s745_s24, 512  ;;  %p1048_p11 = scmp.lt.s32.totalorder %s745_s24, %s745_s24 }
  0x3b   :  { %v915_v3 = vld [vmem:[#allocation5 + $0x80] sm:$0xff]   ;;  %837 = vmatprep.subr.bf16.mxu1 %v914_v2  ;;  %811 = vmatprep.subr.bf16.mxu0 %v916_v4  ;;  %v919_v7 = vld [vmem:[#allocation5 + $0x88] sm:$0xff]   ;;  %v922_v10 = vld [vmem:[#allocation5 + $0xd0] sm:$0xff]   ;;  %p1044_p10 = scmp.ne.s32.totalorder %s745_s24, %s1043_s25  ;;  %p1049_p12 = scmp.lt.s32.totalorder %s1043_s25, %s1043_s25 }
  0x3c   :  { %838 = vmatpush3.bf16.msra.mxu1 %v915_v3  ;;  %v923_v11 = vld [vmem:[#allocation5 + $0x90] sm:$0xff]   ;;  %v924_v12 = vld [vmem:[#allocation5 + $0x58] sm:$0xff]   ;;  %v928_v16 = vld [vmem:[#allocation5 + $0x60] sm:$0xff]  }
  0x3d   :  { %839 = vmatprep.subr.bf16.mxu1 %v918_v6  ;;  %v925_v13 = vld [vmem:[#allocation5 + $0x18] sm:$0xff]   ;;  %v929_v17 = vld [vmem:[#allocation5 + $0x20] sm:$0xff]   ;;  %v932_v20 = vld [vmem:[#allocation5 + $0x68] sm:$0xff]   ;;  %p1050_p13 = por %p1049_p12, %p1048_p11 }
  0x3e   :  { %812 = vmatpush3.bf16.msra.mxu0 %v917_v5  ;;  %v926_v14 = vld [vmem:[#allocation5 + $0xd8] sm:$0xff]   ;;  %v930_v18 = vld [vmem:[#allocation5 + $0xe0] sm:$0xff]   ;;  %v933_v21 = vld [vmem:[#allocation5 + $0x28] sm:$0xff]  }
  0x3f   :  { %813 = vmatprep.subr.bf16.mxu0 %v920_v8  ;;  %v927_v15 = vld [vmem:[#allocation5 + $0x98] sm:$0xff]   ;;  %v931_v19 = vld [vmem:[#allocation5 + $0xa0] sm:$0xff]   ;;  %v934_v22 = vld [vmem:[#allocation5 + $0xe8] sm:$0xff]   ;;  %p1051_p0 = pnand %p1050_p13, %p1044_p10 }
  0x40   :  { %840 = vmatpush3.bf16.msra.mxu1 %v919_v7  ;;  %v935_v23 = vld [vmem:[#allocation5 + $0xa8] sm:$0xff]   ;;  %v936_v24 = vld [vmem:[#allocation5 + $0x70] sm:$0xff]   ;;  %v940_v28 = vld [vmem:[#allocation5 + $0x78] sm:$0xff]  }
  0x41   :  { %841 = vmatprep.subr.bf16.mxu1 %v922_v10  ;;  %v937_v25 = vld [vmem:[#allocation5 + $0x30] sm:$0xff]   ;;  %v941_v29 = vld [vmem:[#allocation5 + $0x38] sm:$0xff]   ;;  %v56_v31 = vld [vmem:[#allocation2 + $0x8] sm:$0xff] }
  0x42   :  { %814 = vmatpush3.bf16.msra.mxu0 %v921_v9  ;;  %v938_v26 = vld [vmem:[#allocation5 + $0xf0] sm:$0xff]   ;;  %v942_v30 = vld [vmem:[#allocation5 + $0xf8] sm:$0xff]   ;;  %v63_v32 = vld [vmem:[#allocation2 + $0x40] sm:$0xff] }
  0x43   :  { %815 = vmatprep.subr.bf16.mxu0 %v924_v12  ;;  %v939_v27 = vld [vmem:[#allocation5 + $0xb0] sm:$0xff]   ;;  %v84_v33 = vpack.c.bf16 %v63_v32, %v56_v31  ;;  %v943_v34 = vld [vmem:[#allocation5 + $0xb8] sm:$0xff]   ;;  %v55_v35 = vld [vmem:[#allocation2] sm:$0xff] }
  0x44   :  { %842 = vmatpush3.bf16.msra.mxu1 %v923_v11  ;;  %v62_v36 = vld [vmem:[#allocation2 + $0x38] sm:$0xff]  ;;  %v944_v38 = vld [vmem:[#allocation5 + $0x140] sm:$0xff]   ;;  %v65_v40 = vld [vmem:[#allocation2 + $0x50] sm:$0xff] }
  0x45   :  { %843 = vmatprep.subr.bf16.mxu1 %v926_v14  ;;  %535 = vmatprep.mubr.bf16.mxu0 %v84_v33  ;;  %v83_v37 = vpack.c.bf16 %v62_v36, %v55_v35  ;;  %v58_v39 = vld [vmem:[#allocation2 + $0x18] sm:$0xff]  ;;  %v945_v42 = vld [vmem:[#allocation5 + $0x100] sm:$0xff]   ;;  %v57_v43 = vld [vmem:[#allocation2 + $0x10] sm:$0xff] }
  0x46   :  { %816 = vmatpush3.bf16.msra.mxu0 %v925_v13  ;;  %v86_v41 = vpack.c.bf16 %v65_v40, %v58_v39  ;;  %v64_v44 = vld [vmem:[#allocation2 + $0x48] sm:$0xff]  ;;  %v948_v48 = vld [vmem:[#allocation5 + $0x150] sm:$0xff]   ;;  %v950_v50 = vld [vmem:[#allocation5 + $0x158] sm:$0xff]  }
  0x47   :  { %817 = vmatprep.subr.bf16.mxu0 %v928_v16  ;;  %v85_v45 = vpack.c.bf16 %v64_v44, %v57_v43  ;;  %v946_v46 = vld [vmem:[#allocation5 + $0x148] sm:$0xff]   ;;  %v949_v49 = vld [vmem:[#allocation5 + $0x110] sm:$0xff]   ;;  %v951_v51 = vld [vmem:[#allocation5 + $0x118] sm:$0xff]  }
  0x48   :  { %844 = vmatpush3.bf16.msra.mxu1 %v927_v15  ;;  %584 = vmatprep.mubr.bf16.mxu1 %v86_v41  ;;  %v947_v47 = vld [vmem:[#allocation5 + $0x108] sm:$0xff]   ;;  %v70_v52 = vld [vmem:[#allocation2 + $0x78] sm:$0xff]  ;;  %v77_v53 = vld [vmem:[#allocation2 + $0xb0] sm:$0xff] }
  0x49   :  { %845 = vmatprep.subr.bf16.mxu1 %v930_v18  ;;  %v952_v54 = vld [vmem:[#allocation5 + $0x160] sm:$0xff]   ;;  %v91_v55 = vpack.c.bf16 %v77_v53, %v70_v52  ;;  %v69_v56 = vld [vmem:[#allocation2 + $0x70] sm:$0xff]  ;;  %v76_v57 = vld [vmem:[#allocation2 + $0xa8] sm:$0xff] }
  0x4a   :  { %818 = vmatpush3.bf16.msra.mxu0 %v929_v17  ;;  %v953_v58 = vld [vmem:[#allocation5 + $0x120] sm:$0xff]   ;;  %v90_v59 = vpack.c.bf16 %v76_v57, %v69_v56  ;;  %v954_v60 = vld [vmem:[#allocation5 + $0x168] sm:$0xff]   ;;  %v78_v1 = vld [vmem:[#allocation2 + $0xb8] sm:$0xff] }
  0x4b   :  { %819 = vmatprep.subr.bf16.mxu0 %v932_v20  ;;  %v72_v61 = vld [vmem:[#allocation2 + $0x88] sm:$0xff]  ;;  %v79_v62 = vld [vmem:[#allocation2 + $0xc0] sm:$0xff]  ;;  %v957_v5 = vld [vmem:[#allocation5 + $0x170] sm:$0xff]  }
  0x4c   :  { %846 = vmatpush3.bf16.msra.mxu1 %v931_v19  ;;  %v71_v63 = vld [vmem:[#allocation2 + $0x80] sm:$0xff]  ;;  %v93_v0 = vpack.c.bf16 %v79_v62, %v72_v61  ;;  %v955_v4 = vld [vmem:[#allocation5 + $0x128] sm:$0xff]   ;;  %v61_v9 = vld [vmem:[#allocation2 + $0x30] sm:$0xff] }
  0x4d   :  { %847 = vmatprep.subr.bf16.mxu1 %v934_v22  ;;  %v92_v2 = vpack.c.bf16 %v78_v1, %v71_v63  ;;  %v956_v3 = vld [vmem:[#allocation5 + $0x180] sm:$0xff]   ;;  %v60_v6 = vld [vmem:[#allocation2 + $0x28] sm:$0xff]  ;;  %v82_v12 = vld [vmem:[#allocation2 + $0xd8] sm:$0xff] }
  0x4e   :  { %820 = vmatpush3.bf16.msra.mxu0 %v933_v21  ;;  %v67_v7 = vld [vmem:[#allocation2 + $0x60] sm:$0xff]  ;;  %v68_v10 = vld [vmem:[#allocation2 + $0x68] sm:$0xff]  ;;  %v958_v13 = vld [vmem:[#allocation5 + $0x130] sm:$0xff]  }
  0x4f   :  { %821 = vmatprep.subr.bf16.mxu0 %v936_v24  ;;  %v88_v8 = vpack.c.bf16 %v67_v7, %v60_v6  ;;  %v75_v11 = vld [vmem:[#allocation2 + $0xa0] sm:$0xff]  ;;  %v89_v14 = vpack.c.bf16 %v68_v10, %v61_v9  ;;  %v959_v16 = vld [vmem:[#allocation5 + $0x178] sm:$0xff]   ;;  %v81_v21 = vld [vmem:[#allocation2 + $0xd0] sm:$0xff] }
  0x50   :  { %848 = vmatpush3.bf16.msra.mxu1 %v935_v23  ;;  %v96_v15 = vpack.c.bf16 %v82_v12, %v75_v11  ;;  %v960_v17 = vld [vmem:[#allocation5 + $0x138] sm:$0xff]   ;;  %v59_v18 = vld [vmem:[#allocation2 + $0x20] sm:$0xff]  ;;  %v73_v24 = vld [vmem:[#allocation2 + $0x90] sm:$0xff] }
  0x51   :  { %849 = vmatprep.subr.bf16.mxu1 %v938_v26  ;;  %v66_v19 = vld [vmem:[#allocation2 + $0x58] sm:$0xff] }
  0x52   :  { %822 = vmatpush3.bf16.msra.mxu0 %v937_v25  ;;  %v74_v20 = vld [vmem:[#allocation2 + $0x98] sm:$0xff]  ;;  %v87_v22 = vpack.c.bf16 %v66_v19, %v59_v18  ;;  %v80_v25 = vld [vmem:[#allocation2 + $0xc8] sm:$0xff] }
  0x53   :  { %823 = vmatprep.subr.bf16.mxu0 %v940_v28  ;;  %v95_v23 = vpack.c.bf16 %v81_v21, %v74_v20  ;;  %v94_v26 = vpack.c.bf16 %v80_v25, %v73_v24  ;;  %v757_v28 = vld [vmem:[#allocation7] ss:$0 sm:$0xff] }
  0x54   :  { %850 = vmatpush3.bf16.msra.mxu1 %v939_v27 }
  0x55   :  { %851 = vmatprep.subr.bf16.mxu1 %v942_v30 }
  0x56   :  { %824 = vmatpush3.bf16.msra.mxu0 %v941_v29 }
  0x57   :  { %865 = vmatprep.subr.bf16.mxu0 %v944_v38 }
  0x58   :  { %852 = vmatpush3.bf16.msra.mxu1 %v943_v34 }
  0x59   :  { %536 = vmatmul.mubr.bf16.vlgmr.msra.gmra.mrb[0].mxu0 %v83_v37  ;;  %896 = vmatprep.subr.bf16.mxu1 %v956_v3 }
  0x5a   :  { %866 = vmatpush3.bf16.msra.mxu0 %v945_v42  ;;  %543 = vmatprep.mubr.bf16.mxu0 %v91_v55 }
  0x5b   :  { %585 = vmatmul.mubr.bf16.vlgmr.msra.gmra.mrb[0].mxu1 %v85_v45  ;;  %867 = vmatprep.subr.bf16.mxu0 %v946_v46 }
  0x5c   :  { %592 = vmatprep.mubr.bf16.mxu1 %v93_v0  ;;  %897 = vmatpush3.bf16.msra.mxu1 %v956_v3 }
  0x5e   :  { %868 = vmatpush3.bf16.msra.mxu0 %v947_v47 }
  0x5f   :  { %869 = vmatprep.subr.bf16.mxu0 %v948_v48 }
  0x61   :  { %544 = vmatmul.mubr.bf16.gmra.mrb[4].mxu0 %v90_v59 }
  0x62   :  { %870 = vmatpush3.bf16.msra.mxu0 %v949_v49  ;;  %633 = vmatprep.mubr.bf16.mxu0 %v88_v8 }
  0x63   :  { %871 = vmatprep.subr.bf16.mxu0 %v950_v50  ;;  %593 = vmatmul.mubr.bf16.gmra.mrb[4].mxu1 %v92_v2 }
  0x64   :  { %898 = vmatprep.mubr.msk.bf16.mxu1 %vm496_vm0, %v89_v14 }
  0x66   :  { %872 = vmatpush3.bf16.msra.mxu0 %v951_v51 }
  0x67   :  { %873 = vmatprep.subr.bf16.mxu0 %v952_v54 }
  0x6a   :  { %874 = vmatpush3.bf16.msra.mxu0 %v953_v58 }
  0x6b   :  { %875 = vmatprep.subr.bf16.mxu0 %v954_v60  ;;  %899 = vmatmul.mubr.msk.bf16.vlgmr.msra.gmra.mrb[8].mxu1 %vm496_vm0, %v96_v15 }
  0x6e   :  { %876 = vmatpush3.bf16.msra.mxu0 %v955_v4 }
  0x6f   :  { %877 = vmatprep.subr.bf16.mxu0 %v957_v5 }
  0x72   :  { %878 = vmatpush3.bf16.msra.mxu0 %v958_v13 }
  0x73   :  { %879 = vmatprep.subr.bf16.mxu0 %v959_v16 }
  0x76   :  { %880 = vmatpush3.bf16.msra.mxu0 %v960_v17 }
  0x79   :  { %634 = vmatmul.mubr.bf16.vlgmr.msra.gmra.mrb[8].mxu0 %v87_v22 }
  0x7a   :  { %641 = vmatprep.mubr.bf16.mxu0 %v95_v23 }
  0x81   :  { %642 = vmatmul.mubr.bf16.gmra.mrb[12].mxu0 %v94_v26 }
 0x12c   :  { %v825_v27 = vpop.f32.mrb[0].mxu0 }
 0x12d   :  { %v826_v29 = vpop.f32.mrb[1].mxu0 }
 0x12e   :  { %v827_v30 = vadd.f32 %v826_v29, %v825_v27  ;;  %v828_v31 = vpop.f32.mrb[2].mxu0  ;;  %v853_v32 = vpop.f32.mrb[0].mxu1 }
 0x12f   :  { %v829_v33 = vpop.f32.mrb[3].mxu0  ;;  %v854_v36 = vpop.f32.mrb[1].mxu1 }
 0x130   :  { %v538_v34 = vadd.f32 %v827_v30, %v757_v28  ;;  %v830_v35 = vadd.f32 %v829_v33, %v828_v31  ;;  %v855_v37 = vadd.f32 %v854_v36, %v853_v32  ;;  %v856_v38 = vpop.f32.mrb[2].mxu1 }
 0x131   :  { %v857_v40 = vpop.f32.mrb[3].mxu1 }
 0x132   :  { %v541_v39 = vadd.f32 %v830_v35, %v757_v28  ;;  %v587_v41 = vadd.f32 %v855_v37, %v538_v34  ;;  %v858_v42 = vadd.f32 %v857_v40, %v856_v38 }
 0x134   :  { %v590_v43 = vadd.f32 %v858_v42, %v541_v39  ;;  %v831_v44 = vpop.f32.mrb[4].mxu0 }
 0x135   :  { %v832_v45 = vpop.f32.mrb[5].mxu0 }
 0x136   :  { %v833_v46 = vadd.f32 %v832_v45, %v831_v44  ;;  %v834_v47 = vpop.f32.mrb[6].mxu0  ;;  %v859_v48 = vpop.f32.mrb[4].mxu1 }
 0x137   :  { %v835_v49 = vpop.f32.mrb[7].mxu0  ;;  %v860_v50 = vpop.f32.mrb[5].mxu1 }
 0x138   :  { %v546_v51 = vadd.f32 %v833_v46, %v757_v28  ;;  %v836_v52 = vadd.f32 %v835_v49, %v834_v47  ;;  %v861_v53 = vadd.f32 %v860_v50, %v859_v48  ;;  %v862_v54 = vpop.f32.mrb[6].mxu1 }
 0x139   :  { %v863_v55 = vpop.f32.mrb[7].mxu1 }
 0x13a   :  { %v549_v56 = vadd.f32 %v836_v52, %v757_v28  ;;  %v595_v57 = vadd.f32 %v861_v53, %v546_v51  ;;  %v864_v58 = vadd.f32 %v863_v55, %v862_v54 }
 0x13c   :  { %v598_v59 = vadd.f32 %v864_v58, %v549_v56 }
 0x13e   :  { %v900_v60 = vpop.f32.mrb[8].mxu1 }
 0x13f   :  { %v684_v61 = vpop.f32.mrb[9].mxu1 }
 0x140   :  { %v901_v62 = vpop.f32.mrb[10].mxu1 }
 0x141   :  { %v687_v63 = vpop.f32.mrb[11].mxu1 }
 0x14c   :  { %v881_v0 = vpop.f32.mrb[8].mxu0 }
 0x14d   :  { %v882_v1 = vpop.f32.mrb[9].mxu0 }
 0x14e   :  { %v883_v2 = vadd.f32 %v882_v1, %v881_v0  ;;  %v884_v3 = vpop.f32.mrb[10].mxu0 }
 0x14f   :  { %v885_v4 = vpop.f32.mrb[11].mxu0 }
 0x150   :  { %v886_v5 = vadd.f32 %v885_v4, %v884_v3  ;;  %v636_v6 = vadd.f32 %v883_v2, %v587_v41 }
 0x152   :  { %v685_v7 = vadd.f32 %v684_v61, %v636_v6  ;;  %v639_v8 = vadd.f32 %v886_v5, %v590_v43 }
 0x154   :  { %v688_v9 = vadd.f32 %v687_v63, %v639_v8  ;;  %v887_v10 = vpop.f32.mrb[12].mxu0  ;;  %699 = vmax.xlane.f32.xlu0 %v685_v7 }
 0x155   :  { %v888_v11 = vpop.f32.mrb[13].mxu0 }
 0x156   :  { %v889_v12 = vadd.f32 %v888_v11, %v887_v10  ;;  %v890_v13 = vpop.f32.mrb[14].mxu0 }
 0x157   :  { %v891_v14 = vpop.f32.mrb[15].mxu0 }
 0x158   :  { %v644_v15 = vadd.f32 %v889_v12, %v595_v57  ;;  %v892_v16 = vadd.f32 %v891_v14, %v890_v13  ;;  %701 = vmax.xlane.f32.xlu0 %v688_v9 }
 0x15a   :  { %v647_v17 = vadd.f32 %v892_v16, %v598_v59  ;;  %v693_v18 = vadd.f32 %v900_v60, %v644_v15 }
 0x15c   :  { %703 = vmax.xlane.f32.xlu1 %v693_v18  ;;  %v696_v19 = vadd.f32 %v901_v62, %v647_v17 }
 0x160   :  { %705 = vmax.xlane.f32.xlu1 %v696_v19 }
 0x1e1   :  { %v700_v20 = vpop.xlane.xlu0 %699 }
 0x1e2   :  { %v707_v21 = vsub.f32 %v685_v7, %v700_v20 }
 0x1e4   :  { %v711_v22 = vmul.f32 1.442695, %v707_v21 }
 0x1e5   :  { %v702_v23 = vpop.xlane.xlu0 %701 }
 0x1e6   :  { %961 = vpow2.f32 %v711_v22  ;;  %v708_v24 = vsub.f32 %v688_v9, %v702_v23 }
 0x1e8   :  { %v713_v25 = vmul.f32 1.442695, %v708_v24 }
 0x1e9   :  { %v704_v26 = vpop.xlane.xlu1 %703 }
 0x1ea   :  { %963 = vpow2.f32 %v713_v25  ;;  %v709_v27 = vsub.f32 %v693_v18, %v704_v26 }
 0x1ec   :  { %v715_v28 = vmul.f32 1.442695, %v709_v27 }
 0x1ed   :  { %v706_v29 = vpop.xlane.xlu1 %705 }
 0x1ee   :  { %965 = vpow2.f32 %v715_v28  ;;  %v710_v30 = vsub.f32 %v696_v19, %v706_v29 }
 0x1f0   :  { %v962_v31 = vpop.eup %961  ;;  %v717_v32 = vmul.f32 1.442695, %v710_v30 }
 0x1f1   :  { %719 = vadd.xlane.f32.xlu0 %v962_v31 }
 0x1f2   :  { %967 = vpow2.f32 %v717_v32 }
 0x1f4   :  { %v964_v33 = vpop.eup %963 }
 0x1f5   :  { %721 = vadd.xlane.f32.xlu1 %v964_v33 }
 0x1f8   :  { %v966_v34 = vpop.eup %965 }
 0x1f9   :  { %723 = vadd.xlane.f32.xlu0 %v966_v34 }
 0x1fc   :  { %v968_v35 = vpop.eup %967 }
 0x1fd   :  { %725 = vadd.xlane.f32.xlu1 %v968_v35 }
 0x27e   :  { %v720_v36 = vpop.xlane.xlu0 %719 }
 0x27f   :  { %969 = vrcp.f32 %v720_v36 }
 0x282   :  { %v722_v37 = vpop.xlane.xlu1 %721 }
 0x283   :  { %971 = vrcp.f32 %v722_v37 }
 0x286   :  { %v724_v38 = vpop.xlane.xlu0 %723 }
 0x287   :  { %973 = vrcp.f32 %v724_v38 }
 0x289   :  { %v970_v39 = vpop.eup %969 }
 0x28a   :  { %v728_v40 = vmul.f32 %v970_v39, %v962_v31  ;;  %v726_v41 = vpop.xlane.xlu1 %725 }
 0x28b   :  { %975 = vrcp.f32 %v726_v41 }
 0x28c   :  { %735 = vst [vmem:[#allocation8] sm:$0xff] %v728_v40 }
 0x28d   :  { %v972_v42 = vpop.eup %971 }
 0x28e   :  { %v730_v43 = vmul.f32 %v972_v42, %v964_v33 }
 0x290   :  { %736 = vst [vmem:[#allocation8 + $0x8] sm:$0xff] %v730_v43 }
 0x291   :  { %v974_v44 = vpop.eup %973 }
 0x292   :  { %v732_v45 = vmul.f32 %v974_v44, %v966_v34 }
 0x294   :  { %737 = vst [vmem:[#allocation8 + $0x10] sm:$0xff] %v732_v45 }
 0x295   :  { %v976_v46 = vpop.eup %975 }
 0x296   :  { %v734_v47 = vmul.f32 %v976_v46, %v968_v35 }
 0x298   :  { %738 = vst [vmem:[#allocation8 + $0x18] sm:$0xff] %v734_v47 }
 0x299   :  { %1054 = shalt.err (!%p1051_p0)
}
 0x29a   :  { %s1055_s28 = scalar_lea.hbm %s1152_s3, 512 }
 0x29b   :  { %p1056_p1 = scmp.ne.s32.totalorder %s1152_s3, %s1055_s28  ;;  %p1059_p2 = scmp.lt.u32.totalorder %s1055_s28, %s1152_s3 }
 0x29d   :  { %p1061_p3 = pnand %p1059_p2, %p1056_p1 }
 0x29f   :  { %1064 = shalt.err (!%p1061_p3)
}
 0x2a0   :  { %s1079_s6 = smov 128   ;;  %s1080_s7 = smov 8  }
 0x2a1   :  { %750 = dma.vmem_to_hbm [thread:$0]  %s745_s24, 512, %s1152_s3, [#allocation4], %s1079_s6, %s1079_s6, %s1080_s7  }
 0x2a2   :  { %1069 = dma.done.wait [#allocation4], 512  }
 0x2a3   :  { %1070 = vsyncadd [#allocation4], 4294966784 }
 0x2a4   :  { %754 = vsyncpa [#allocation3], 1 }
 0x2a5   :  { %755 = vsyncpa [#allocation6], 1 }
 0x2a6   :  { %756 = vsyncpa [#allocation4], 1 }

</bundles_post_ra>
